<compile_context>
chip_gen: v6e
topology: v6e:2x2x1
jax: 0.10.0
libtpu: 0.0.40
codegen_flags: <defaults>
</compile_context>

<pallas_src>
import jax
import jax.numpy as jnp
from jax.experimental import pallas as pl
from jax.experimental.pallas import tpu as pltpu


def _round_up(x: int, m: int) -> int:
    return (x + m - 1) // m * m


def _classification_kernel(x_ref, w_ref, bias_ref, t_ref, o_ref, acc_ref):
    # x_ref:    (bm, bk)        bf16  flattened image tile (raw pixels; norm folded into W')
    # w_ref:    (bk, E_pad)     bf16  folded encoder weights tile  W' = diag(1/std) @ W
    # bias_ref: (1, E_pad)      f32   folded bias  -(mean/std) @ W
    # t_ref:    (E_pad, N_pad)  bf16  text embedding, pre-scaled by exp(logit_scale)
    # o_ref:    (bm, N_pad)     f32   logits
    # acc_ref:  (bm, E_pad)     f32   VMEM accumulator for the image embedding
    k = pl.program_id(1)

    @pl.when(k == 0)
    def _():
        # Seed the accumulator with the folded normalization bias (broadcast over rows).
        acc_ref[...] = jnp.broadcast_to(bias_ref[...], acc_ref.shape)

    # encode_image: accumulate x @ W' on the MXU, f32 accumulation.
    acc_ref[...] += jnp.dot(x_ref[...], w_ref[...],
                            preferred_element_type=jnp.float32)

    # Epilogue only on the last K step: L2-normalize, logits matmul, store.
    @pl.when(k == pl.num_programs(1) - 1)
    def _():
        emb = acc_ref[...]                                          # (bm, E_pad)
        sq = jnp.sum(emb * emb, axis=-1, keepdims=True)             # (bm, 1)
        emb_n = emb * jax.lax.rsqrt(jnp.maximum(sq, 1e-12))         # normalize=True
        logits = jnp.dot(emb_n.astype(t_ref.dtype), t_ref[...],
                         preferred_element_type=jnp.float32)        # (bm, N_pad)
        o_ref[...] = logits


def classification_model_forward(vision, mean_c, std_c, w_enc, text_embedding,
                                 logit_scale, *, bk=512, bm_max=128):
    """vision: (B, C, H, W) NCHW float32. Returns logits (B, N_cls) float32."""
    B, C, H, W = vision.shape
    D_in = C * H * W
    E, N_cls = text_embedding.shape

    # ---- constant folding (once per set of weights; trivial vs. the matmuls) ----
    mean_c = mean_c.astype(jnp.float32)
    invstd_c = 1.0 / std_c.astype(jnp.float32)
    mean_flat = jnp.repeat(mean_c, H * W)                 # (D_in,) matches reshape(B, C*H*W)
    invstd_flat = jnp.repeat(invstd_c, H * W)             # (D_in,)
    w_f32 = w_enc.astype(jnp.float32)
    w_fold = invstd_flat[:, None] * w_f32                 # W' = diag(1/std) @ W
    bias = -(mean_flat * invstd_flat) @ w_f32             # (E,)
    t_scaled = text_embedding.astype(jnp.float32) * jnp.exp(
        jnp.asarray(logit_scale, jnp.float32))            # fold logit_scale.exp() into t

    # ---- tiling / padding to MXU- and lane-friendly shapes ----
    bm = min(bm_max, _round_up(B, 8))                     # M tile (sublane multiple)
    B_pad = _round_up(B, bm)
    bk = min(bk, _round_up(D_in, 128))                    # K tile (lane multiple)
    D_pad = _round_up(D_in, bk)
    E_pad = _round_up(E, 128)                             # lane-dense embedding dim
    N_pad = _round_up(N_cls, 128)                         # lane-dense output dim

    x_flat = vision.reshape(B, D_in)
    x_p = jnp.zeros((B_pad, D_pad), jnp.bfloat16).at[:B, :D_in].set(
        x_flat.astype(jnp.bfloat16))
    w_p = jnp.zeros((D_pad, E_pad), jnp.bfloat16).at[:D_in, :E].set(
        w_fold.astype(jnp.bfloat16))
    bias_p = jnp.zeros((1, E_pad), jnp.float32).at[0, :E].set(bias)
    t_p = jnp.zeros((E_pad, N_pad), jnp.bfloat16).at[:E, :N_cls].set(
        t_scaled.astype(jnp.bfloat16))

    grid = (B_pad // bm, D_pad // bk)                     # (parallel batch, arbitrary K)

    # VMEM budget: double-buffered inputs/outputs + resident accumulator, with headroom.
    vmem_bytes = (
        2 * bm * bk * 2          # x tiles (bf16, double-buffered)
        + 2 * bk * E_pad * 2     # w tiles (bf16, double-buffered)
        + 2 * 1 * E_pad * 4      # bias (f32)
        + 2 * E_pad * N_pad * 2  # text embedding (bf16, resident)
        + 2 * bm * N_pad * 4     # output tiles (f32)
        + bm * E_pad * 4         # accumulator scratch (f32)
    )
    vmem_limit = min(max(vmem_bytes + (8 << 20), 32 << 20), 64 << 20)  # v7x-safe cap

    cost = pl.CostEstimate(
        flops=2 * B_pad * D_pad * E_pad + 2 * B_pad * E_pad * N_pad,
        transcendentals=B_pad,
        bytes_accessed=(x_p.size * 2 + w_p.size * 2 + bias_p.size * 4
                        + t_p.size * 2 + B_pad * N_pad * 4),
    )

    out = pl.pallas_call(
        _classification_kernel,
        out_shape=jax.ShapeDtypeStruct((B_pad, N_pad), jnp.float32),
        grid_spec=pltpu.PrefetchScalarGridSpec(
            num_scalar_prefetch=0,
            grid=grid,
            in_specs=[
                pl.BlockSpec((bm, bk), lambda i, k: (i, k)),        # x tile
                pl.BlockSpec((bk, E_pad), lambda i, k: (k, 0)),     # W' tile (streamed)
                pl.BlockSpec((1, E_pad), lambda i, k: (0, 0)),      # bias (resident)
                pl.BlockSpec((E_pad, N_pad), lambda i, k: (0, 0)),  # text emb (resident)
            ],
            out_specs=pl.BlockSpec((bm, N_pad), lambda i, k: (i, 0)),
            scratch_shapes=[pltpu.VMEM((bm, E_pad), jnp.float32)],
        ),
        compiler_params=pltpu.CompilerParams(
            dimension_semantics=("parallel", "arbitrary"),
            vmem_limit_bytes=vmem_limit,
        ),
        cost_estimate=cost,
    )(x_p, w_p, bias_p, t_p)

    return out[:B, :N_cls]


def _reference_forward(vision, mean_c, std_c, w_enc, text_embedding, logit_scale):
    B, C, H, W = vision.shape
    x = (vision - mean_c.reshape(1, C, 1, 1)) / std_c.reshape(1, C, 1, 1)
    x = x.reshape(B, -1)
    emb = x @ w_enc
    emb = emb / jnp.linalg.norm(emb, axis=-1, keepdims=True)
    return (emb @ text_embedding) * jnp.exp(logit_scale)


if __name__ == "__main__":
    key = jax.random.PRNGKey(0)
    k_x, k_w, k_t = jax.random.split(key, 3)

    # Small shapes consistent with the forward pass.
    B, C, H, W = 2, 4, 16, 16          # vision: NCHW
    E, N_cls = 128, 256                # embedding dim, number of class prompts
    D_in = C * H * W

    vision = jax.random.normal(k_x, (B, C, H, W), dtype=jnp.float32)

    # Deterministic synthetic parameters.
    mean_c = jnp.array([0.48145466, 0.4578275, 0.40821073, 0.5], dtype=jnp.float32)
    std_c = jnp.array([0.26862954, 0.26130258, 0.27577711, 0.25], dtype=jnp.float32)
    w_enc = jax.random.normal(k_w, (D_in, E), dtype=jnp.float32) * (D_in ** -0.5)
    text_embedding = jax.random.normal(k_t, (E, N_cls), dtype=jnp.float32) * (E ** -0.5)
    logit_scale = jnp.float32(jnp.log(100.0))   # CLIP-style raw logit_scale

    logits = classification_model_forward(
        vision, mean_c, std_c, w_enc, text_embedding, logit_scale)
    logits = jax.block_until_ready(logits)

    ref = _reference_forward(vision, mean_c, std_c, w_enc, text_embedding, logit_scale)
    assert logits.shape == (B, N_cls)
    # Tolerance accounts for bf16 MXU inputs (f32 accumulation) vs. the f32 reference,
    # amplified by the logit_scale.exp() ~= 100 factor.
    assert jnp.allclose(logits, ref, atol=3e-1, rtol=2e-2), (
        float(jnp.max(jnp.abs(logits - ref))))

    print("KERNEL_OK")
</pallas_src>

<mosaic_0001>
module attributes {stable_mosaic.version = 11 : i64} {
  func.func @_classification_kernel(%arg0: i32, %arg1: i32, %arg2: memref<8x512xbf16, #tpu.memory_space<vmem>>, %arg3: memref<512x128xbf16, #tpu.memory_space<vmem>>, %arg4: memref<1x128xf32, #tpu.memory_space<vmem>>, %arg5: memref<128x256xbf16, #tpu.memory_space<vmem>>, %arg6: memref<8x256xf32, #tpu.memory_space<vmem>>, %arg7: memref<8x128xf32, #tpu.memory_space<vmem>>) attributes {dimension_semantics = [#tpu.dimension_semantics<parallel>, #tpu.dimension_semantics<arbitrary>], iteration_bounds = array<i64: 1, 2>, scalar_prefetch = 0 : i64, scratch_operands = 1 : i64, tpu.core_type = #tpu.core_type<tc>, window_params = [{transform_indices = @transform_0, window_bounds = array<i64: 8, 512>}, {transform_indices = @transform_1, window_bounds = array<i64: 512, 128>}, {pipeline_mode = #tpu.pipeline_mode<synchronous>, transform_indices = @transform_2, window_bounds = array<i64: 1, 128>}, {pipeline_mode = #tpu.pipeline_mode<synchronous>, transform_indices = @transform_3, window_bounds = array<i64: 128, 256>}, {transform_indices = @transform_4, window_bounds = array<i64: 8, 256>}]} {
    %c0_i32 = arith.constant 0 : i32
    %0 = arith.cmpi eq, %arg1, %c0_i32 : i32
    %1 = arith.extui %0 : i1 to i32
    %c0_i32_0 = arith.constant 0 : i32
    %2 = arith.cmpi ne, %1, %c0_i32_0 : i32
    scf.if %2 {
      %c0_9 = arith.constant 0 : index
      %c0_10 = arith.constant 0 : index
      %12 = vector.load %arg4[%c0_9, %c0_10] : memref<1x128xf32, #tpu.memory_space<vmem>>, vector<1x128xf32>
      %13 = vector.shape_cast %12 : vector<1x128xf32> to vector<1x128xf32>
      %14 = vector.broadcast %13 : vector<1x128xf32> to vector<8x128xf32>
      %c0_11 = arith.constant 0 : index
      %c0_12 = arith.constant 0 : index
      %15 = vector.load %arg7[%c0_11, %c0_12] : memref<8x128xf32, #tpu.memory_space<vmem>>, vector<8x128xf32>
      tpu.vector_store %arg7[%c0_11, %c0_12], %14 {strides = array<i32>} : memref<8x128xf32, #tpu.memory_space<vmem>>, vector<8x128xf32>,
    } else {
    }
    %c0 = arith.constant 0 : index
    %c0_1 = arith.constant 0 : index
    %3 = vector.load %arg7[%c0, %c0_1] : memref<8x128xf32, #tpu.memory_space<vmem>>, vector<8x128xf32>
    %c0_2 = arith.constant 0 : index
    %c0_3 = arith.constant 0 : index
    %4 = vector.load %arg2[%c0_2, %c0_3] : memref<8x512xbf16, #tpu.memory_space<vmem>>, vector<8x512xbf16>
    %c0_4 = arith.constant 0 : index
    %c0_5 = arith.constant 0 : index
    %5 = vector.load %arg3[%c0_4, %c0_5] : memref<512x128xbf16, #tpu.memory_space<vmem>>, vector<512x128xbf16>
    %cst = arith.constant dense<0.000000e+00> : vector<8x128xf32>
    %6 = tpu.matmul %4, %5, %cst {dimension_numbers = #tpu.dot_dimension_numbers<[1], [0], [0], [1], [0, 0, 1, 1], [], []>} : vector<8x512xbf16>, vector<512x128xbf16>, vector<8x128xf32> -> vector<8x128xf32>
    %7 = arith.addf %3, %6 : vector<8x128xf32>
    %c0_6 = arith.constant 0 : index
    %c0_7 = arith.constant 0 : index
    %8 = vector.load %arg7[%c0_6, %c0_7] : memref<8x128xf32, #tpu.memory_space<vmem>>, vector<8x128xf32>
    tpu.vector_store %arg7[%c0_6, %c0_7], %7 {strides = array<i32>} : memref<8x128xf32, #tpu.memory_space<vmem>>, vector<8x128xf32>,
    %c1_i32 = arith.constant 1 : i32
    %9 = arith.cmpi eq, %arg1, %c1_i32 : i32
    %10 = arith.extui %9 : i1 to i32
    %c0_i32_8 = arith.constant 0 : i32
    %11 = arith.cmpi ne, %10, %c0_i32_8 : i32
    scf.if %11 {
      %c0_9 = arith.constant 0 : index
      %c0_10 = arith.constant 0 : index
      %12 = vector.load %arg7[%c0_9, %c0_10] : memref<8x128xf32, #tpu.memory_space<vmem>>, vector<8x128xf32>
      %13 = arith.mulf %12, %12 : vector<8x128xf32>
      %cst_11 = arith.constant dense<0.000000e+00> : vector<8xf32>
      %14 = vector.multi_reduction <add>, %13, %cst_11 [1] : vector<8x128xf32> to vector<8xf32>
      %15 = vector.shape_cast %14 : vector<8xf32> to vector<8x1xf32>
      %cst_12 = arith.constant 9.99999996E-13 : f32
      %16 = vector.broadcast %cst_12 : f32 to vector<8x1xf32>
      %17 = arith.maximumf %15, %16 : vector<8x1xf32>
      %18 = math.rsqrt %17 : vector<8x1xf32>
      %19 = vector.broadcast %18 : vector<8x1xf32> to vector<8x128xf32>
      %20 = arith.mulf %12, %19 : vector<8x128xf32>
      %21 = arith.truncf %20 : vector<8x128xf32> to vector<8x128xbf16>
      %c0_13 = arith.constant 0 : index
      %c0_14 = arith.constant 0 : index
      %22 = vector.load %arg5[%c0_13, %c0_14] : memref<128x256xbf16, #tpu.memory_space<vmem>>, vector<128x256xbf16>
      %cst_15 = arith.constant dense<0.000000e+00> : vector<8x256xf32>
      %23 = tpu.matmul %21, %22, %cst_15 {dimension_numbers = #tpu.dot_dimension_numbers<[1], [0], [0], [1], [0, 0, 1, 1], [], []>} : vector<8x128xbf16>, vector<128x256xbf16>, vector<8x256xf32> -> vector<8x256xf32>
      %c0_16 = arith.constant 0 : index
      %c0_17 = arith.constant 0 : index
      %24 = vector.load %arg6[%c0_16, %c0_17] : memref<8x256xf32, #tpu.memory_space<vmem>>, vector<8x256xf32>
      tpu.vector_store %arg6[%c0_16, %c0_17], %23 {strides = array<i32>} : memref<8x256xf32, #tpu.memory_space<vmem>>, vector<8x256xf32>,
    } else {
    }
    return
  }
  func.func @transform_0(%arg0: i32, %arg1: i32) -> (i32, i32) {
    %c0_i32 = arith.constant 0 : i32
    return %arg0, %arg1 : i32, i32
  }
  func.func @transform_1(%arg0: i32, %arg1: i32) -> (i32, i32) {
    %c0_i32 = arith.constant 0 : i32
    %c0_i32_0 = arith.constant 0 : i32
    return %arg1, %c0_i32 : i32, i32
  }
  func.func @transform_2(%arg0: i32, %arg1: i32) -> (i32, i32) {
    %c0_i32 = arith.constant 0 : i32
    %c0_i32_0 = arith.constant 0 : i32
    %c0_i32_1 = arith.constant 0 : i32
    return %c0_i32, %c0_i32_0 : i32, i32
  }
  func.func @transform_3(%arg0: i32, %arg1: i32) -> (i32, i32) {
    %c0_i32 = arith.constant 0 : i32
    %c0_i32_0 = arith.constant 0 : i32
    %c0_i32_1 = arith.constant 0 : i32
    return %c0_i32, %c0_i32_0 : i32, i32
  }
  func.func @transform_4(%arg0: i32, %arg1: i32) -> (i32, i32) {
    %c0_i32 = arith.constant 0 : i32
    %c0_i32_0 = arith.constant 0 : i32
    return %arg0, %c0_i32 : i32, i32
  }
}

</mosaic_0001>

<bundles_post_ra>
// kernel: tpu_custom_call.1
= control target key start
LH: loop header
LB: loop body
LE: loop exit
PB: predicated region body
PF: predicated region fallthrough
CT: control target
= control target key end

     0   :  { %9 = vsyncpa [#allocation4], 0  ;;  %s1560_s0 = inlined_call_operand.hbm [shape: bf16[8,1024], index: 0, kind: input, shape index: {}]   ;;  %s1561_s1 = inlined_call_operand.hbm [shape: bf16[1024,128], index: 1, kind: input, shape index: {}]   ;;  %s1562_s2 = inlined_call_operand.vmem [shape: f32[1,128], index: 2, kind: input, shape index: {}]   ;;  %s1563_s3 = inlined_call_operand.hbm [shape: bf16[128,256], index: 3, kind: input, shape index: {}]   ;;  %s1564_s4 = inlined_call_operand.hbm [shape: f32[8,256], index: 4, kind: output, shape index: {}]  }
   0x1   :  { %11 = vsyncpa [#allocation4 + $0x1], 0 }
   0x2   :  { %12 = vsyncpa [#allocation7], 0 }
   0x3   :  { %14 = vsyncpa [#allocation7 + $0x1], 0 }
   0x4   :  { %15 = vsyncpa [#allocation5], 0  ;;  %s1372_s15 = smov 0   ;;  %s1374_s16 = smov 0  }
   0x5   :  { %s1376_s17 = smov 0   ;;  %s1378_s18 = smov 0  }
   0x6   :  { %s1380_s19 = smov 0   ;;  %s1382_s20 = smov 0  }
   0x7 LB: > { %s1401_s21 = sadd.s32 4294967295, %s1336_s20   ;;  %p55_p0 = scmp.ne.s32.totalorder %s1320_s16, %s1316_s15  ;;  %s1336_s20 = sphi %s1382_s20, %s21_s20   ;;  %s1332_s19 = sphi %s1380_s19, %s1573_s19   ;;  %s1328_s18 = sphi %s1378_s18, %s1572_s18   ;;  %s1324_s17 = sphi %s1376_s17, %s1571_s17   ;;  %s1320_s16 = sphi %s1374_s16, %s1570_s16   ;;  %s1316_s15 = sphi %s1372_s15, %s1569_s15  }
   0x8   : > { %p56_p1 = scmp.eq.s32.totalorder %s1401_s21, 0  ;;  %p905_p2 = scmp.ge.s32.totalorder %s1336_s20, 1 }
   0x9   : > { %p160_p3 = scmp.lt.s32.totalorder %s1336_s20, 3  ;;  %s1338_s24 = smov [#allocation8]  }
   0xa   : > { %p1409_p4 = por %p56_p1, %p55_p0  ;;  %s175_s25 = sshll.u32 %s1338_s24, 4  ;;  %s176_s25 = int_to_ptr.vmem [resolvable:$true] %s175_s25 }
   0xb   : > { %p1413_p5 = pnand %p905_p2, %p160_p3  ;;  %s30_s27 = sadd.s32 1, %s1332_s19 }
   0xc   : > { %s1179_s28 = scalar_lea.vmem %s176_s25, 2048  ;;  %p1187_p12 = scmp.lt.s32.totalorder %s176_s25, %s176_s25 }
   0xd   : > { %p1035_p6 = pneg %p1413_p5  ;;  %p1180_p9 = scmp.ne.s32.totalorder %s176_s25, %s1179_s28 }
   0xe   : > { %p1188_p13 = scmp.lt.s32.totalorder %s1179_s28, %s1179_s28 }
   0xf   : > { %p1421_p7 = pnand %p1035_p6, %p56_p1 }
  0x10   : > { %p1189_p0 = por %p1188_p13, %p1187_p12 }
  0x11   : > { %p1170_p8 = pneg %p1421_p7 }
  0x13   : > { %p1182_p10 = pnand %p1180_p9, %p1170_p8 }
  0x15   : > { %p1183_p11 = pneg %p1182_p10 }
  0x17   : > { %p1190_p2 = pnand %p1189_p0, %p1183_p11 }
  0x19   : > { %1193 = shalt.err (!%p1190_p2)
}
  0x1a   : > { %s1339_s29 = smov 128   ;;  %s1340_s30 = smov 8  }
  0x1b   : > { %1038 = dma.hbm_to_vmem [thread:$0]  (!%p1421_p7), %s1563_s3, 2048, %s176_s25, [#allocation7], %s1339_s29, %s1339_s29, %s1340_s30  }
  0x1c   : > { %p31_p3 = scmp.ge.s32.totalorder %s30_s27, 2  ;;  %s42_s7 = sadd.s32 1, %s1324_s17 }
  0x1d   : > { %p49_p6 = scmp.ne.s32.totalorder %s1324_s17, %s1320_s16  ;;  %p50_p8 = scmp.eq.s32.totalorder %s1336_s20, 0 }
  0x1e   : > { %s1575_s27 = smov (%p31_p3, %s30_s27), 0  ;;  %p1047_p10 = scmp.lt.s32.totalorder %s1336_s20, 2 }
  0x1f   : > { %p51_p9 = por %p50_p8, %p49_p6  ;;  %s38_s8 = ssub.s32 %s1332_s19, %s1575_s27 }
  0x20   : > { %s189_s9 = sand.u32 1, %s1324_s17   ;;  %p40_p11 = scmp.eq.s32.totalorder %s38_s8, 0 }
  0x21   : > { %s908_s10 = sshll.u32 %s189_s9, 4  ;;  %s977_s11 = sshll.u32 %s1332_s19, 8 }
  0x22   : > { %s1445_s12 = scalar_select %p40_p11, %s1324_s17, %s42_s7  }
  0x23   : > { %s201_s15 = scalar_lea.hbm %s1560_s0, %s977_s11  ;;  %s193_s24 = scalar_lea.vmem [#allocation3], %s908_s10 }
  0x24   : > { %s203_s25 = sshll.u32 %s193_s24, 4  ;;  %p1450_p7 = pnand %p1047_p10, %p51_p9  ;;  %s204_s25 = int_to_ptr.vmem [resolvable:$true] %s203_s25 }
  0x25   : > { %s911_s28 = sshll.u32 %s189_s9, 8  ;;  %s190_s29 = scalar_lea.sflag [#allocation4], %s189_s9 }
  0x26   : > { %p1196_p12 = pneg %p1450_p7  ;;  %s1207_s30 = scalar_lea.vmem %s204_s25, 256 }
  0x27   : > { %p1208_p13 = scmp.ne.s32.totalorder %s204_s25, %s1207_s30  ;;  %s1341_s5 = smov [#allocation3]  }
  0x28   : > { %s1212_s6 = sshll.u32 %s1341_s5, 4  ;;  %s1213_s6 = int_to_ptr.vmem [resolvable:$false] %s1212_s6 }
  0x29   : > { %p1210_p0 = pnand %p1208_p13, %p1196_p12  ;;  %s1214_s7 = scalar_lea.vmem %s1213_s6, 512 }
  0x2a   : > { %p1215_p3 = scmp.lt.s32.totalorder %s204_s25, %s1213_s6  ;;  %p1216_p6 = scmp.lt.s32.totalorder %s1214_s7, %s1207_s30 }
  0x2b   : > { %p1211_p2 = pneg %p1210_p0 }
  0x2c   : > { %p1217_p8 = por %p1216_p6, %p1215_p3 }
  0x2e   : > { %p1218_p9 = pnand %p1217_p8, %p1211_p2 }
  0x30   : > { %1221 = shalt.err (!%p1218_p9)
}
  0x31   : > { %1042 = dma.hbm_to_vmem [thread:$0]  (!%p1450_p7), %s201_s15, 256, %s204_s25, %s190_s29  }
  0x32   : > { %s978_s8 = sshll.u32 %s1332_s19, 12  ;;  %s214_s9 = scalar_lea.vmem [#allocation6], %s911_s28 }
  0x33   : > { %s221_s10 = sshll.u32 %s214_s9, 4  ;;  %s210_s11 = sand.u32 1, %s1336_s20   ;;  %s222_s10 = int_to_ptr.vmem [resolvable:$true] %s221_s10 }
  0x34   : > { %s220_s24 = scalar_lea.hbm %s1561_s1, %s978_s8  ;;  %s211_s5 = scalar_lea.sflag [#allocation7], %s210_s11 }
  0x35   : > { %s1235_s30 = scalar_lea.vmem %s222_s10, 4096  ;;  %s1342_s6 = smov [#allocation6]  }
  0x36   : > { %p1236_p10 = scmp.ne.s32.totalorder %s222_s10, %s1235_s30  ;;  %s1240_s7 = sshll.u32 %s1342_s6, 4  ;;  %s1241_s7 = int_to_ptr.vmem [resolvable:$false] %s1240_s7 }
  0x37   : > { %s1242_s15 = scalar_lea.vmem %s1241_s7, 8192  ;;  %p1243_p0 = scmp.lt.s32.totalorder %s222_s10, %s1241_s7 }
  0x38   : > { %p1238_p11 = pnand %p1236_p10, %p1196_p12  ;;  %p1244_p2 = scmp.lt.s32.totalorder %s1242_s15, %s1235_s30 }
  0x3a   : > { %p1239_p13 = pneg %p1238_p11  ;;  %p1245_p3 = por %p1244_p2, %p1243_p0 }
  0x3c   : > { %p1246_p6 = pnand %p1245_p3, %p1239_p13 }
  0x3e   : > { %1249 = shalt.err (!%p1246_p6)
}
  0x3f   : > { %s1343_s25 = smov 64   ;;  %s1344_s28 = smov 4  }
  0x40   : > { %1045 = dma.hbm_to_vmem [thread:$0]  (!%p1450_p7), %s220_s24, 4096, %s222_s10, %s211_s5, %s1343_s25, %s1343_s25, %s1344_s28  }
  0x41   : > { %233 = sbr.rel (%p1413_p5) target bundleno = 703 (0x2bf), region = 36  ;;  %s235_s29 = sand.u32 (!%p1413_p5), 1, %s1320_s16  }
  0x42   : > { %s915_s8 = sshll.u32 (!%p1413_p5), %s235_s29, 4  ;;  %s236_s9 = scalar_lea.sflag (!%p1413_p5), [#allocation4], %s235_s29 }
  0x43   : > { %s1474_s11 = scalar_lea.vmem (!%p1413_p5), [#allocation3], %s915_s8 }
  0x46   : > { %1299 = dma.done.wait (%p1409_p4), %s236_s9, 256  }
  0x47   : > { %1301 = vsyncadd (%p1409_p4), %s236_s9, 4294967040  ;;  %s244_s13 = sand.u32 1, %s1401_s21   ;;  %s916_s26 = sshll.u32 %s235_s29, 8 }
  0x48   : > { %s245_s10 = scalar_lea.sflag [#allocation7], %s244_s13  ;;  %s1481_s14 = scalar_lea.vmem [#allocation6], %s916_s26 }
  0x49   : > { %1303 = dma.done.wait (%p1409_p4), %s245_s10, 4096  }
  0x4a   : > { %1305 = vsyncadd (%p1409_p4), %s245_s10, 4294963200 }
  0x4b   : > { %1307 = dma.done.wait (%p56_p1), [#allocation7], 2048  }
  0x4c   : > { %1309 = vsyncadd (%p56_p1), [#allocation7], 4294965248  ;;  %p918_p5 = scmp.ne.s32.totalorder %s1328_s18, 0 }
  0x4e   : > { %283 = sbr.rel (%p918_p5) target bundleno = 85 (0x55), region = 52 }
  0x53   : > { %v919_v0 = vld [vmem:[%s1562_s2] ss:$0 sm:$0xff] }
  0x54   : > { %291 = vst [vmem:[#allocation2] sm:$0xff] %v919_v0 }
  0x55 PF: > { %v1106_v1 = vld [vmem:[%s1481_s14 + $0x78] sm:$0xff]   ;;  %v1110_v5 = vld [vmem:[%s1481_s14 + $0x70] sm:$0xff]   ;;  %v1114_v9 = vld [vmem:[%s1481_s14 + $0x68] sm:$0xff]   ;;  %p956_p1 = scmp.ne.s32.totalorder %s1328_s18, 1 }
  0x56   : > { %v1107_v2 = vld [vmem:[%s1481_s14 + $0xf8] sm:$0xff]   ;;  %979 = vmatprep.subr.bf16.mxu0 %v1106_v1  ;;  %v1111_v6 = vld [vmem:[%s1481_s14 + $0xf0] sm:$0xff]   ;;  %v1115_v10 = vld [vmem:[%s1481_s14 + $0xe8] sm:$0xff]  }
  0x57   : > { %v1108_v3 = vld [vmem:[%s1481_s14 + $0x38] sm:$0xff]   ;;  %1001 = vmatprep.subr.bf16.mxu1 %v1107_v2  ;;  %v1112_v7 = vld [vmem:[%s1481_s14 + $0x30] sm:$0xff]   ;;  %v1116_v11 = vld [vmem:[%s1481_s14 + $0x28] sm:$0xff]  }
  0x58   : > { %v1109_v4 = vld [vmem:[%s1481_s14 + $0xb8] sm:$0xff]   ;;  %980 = vmatpush3.bf16.msra.mxu0 %v1108_v3  ;;  %v1113_v8 = vld [vmem:[%s1481_s14 + $0xb0] sm:$0xff]   ;;  %v1117_v12 = vld [vmem:[%s1481_s14 + $0xa8] sm:$0xff]  }
  0x59   : > { %1002 = vmatpush3.bf16.msra.mxu1 %v1109_v4  ;;  %981 = vmatprep.subr.bf16.mxu0 %v1110_v5  ;;  %v1118_v13 = vld [vmem:[%s1481_s14 + $0x60] sm:$0xff]   ;;  %v1122_v17 = vld [vmem:[%s1481_s14 + $0x58] sm:$0xff]   ;;  %v1126_v21 = vld [vmem:[%s1481_s14 + $0x50] sm:$0xff]  }
  0x5a   : > { %1003 = vmatprep.subr.bf16.mxu1 %v1111_v6  ;;  %v1119_v14 = vld [vmem:[%s1481_s14 + $0xe0] sm:$0xff]   ;;  %v1123_v18 = vld [vmem:[%s1481_s14 + $0xd8] sm:$0xff]   ;;  %v1127_v22 = vld [vmem:[%s1481_s14 + $0xd0] sm:$0xff]  }
  0x5b   : > { %v1120_v15 = vld [vmem:[%s1481_s14 + $0x20] sm:$0xff]   ;;  %v1124_v19 = vld [vmem:[%s1481_s14 + $0x18] sm:$0xff]   ;;  %v1128_v23 = vld [vmem:[%s1481_s14 + $0x10] sm:$0xff]  }
  0x5c   : > { %982 = vmatpush3.bf16.msra.mxu0 %v1112_v7  ;;  %v1121_v16 = vld [vmem:[%s1481_s14 + $0xa0] sm:$0xff]   ;;  %v1125_v20 = vld [vmem:[%s1481_s14 + $0x98] sm:$0xff]   ;;  %v1129_v24 = vld [vmem:[%s1481_s14 + $0x90] sm:$0xff]  }
  0x5d   : > { %1004 = vmatpush3.bf16.msra.mxu1 %v1113_v8  ;;  %983 = vmatprep.subr.bf16.mxu0 %v1114_v9  ;;  %v1130_v25 = vld [vmem:[%s1481_s14 + $0x48] sm:$0xff]   ;;  %v1134_v29 = vld [vmem:[%s1481_s14 + $0x40] sm:$0xff]   ;;  %v292_v45 = vld [vmem:[#allocation2] sm:$0xff] }
  0x5e   : > { %1005 = vmatprep.subr.bf16.mxu1 %v1115_v10  ;;  %v1131_v26 = vld [vmem:[%s1481_s14 + $0xc8] sm:$0xff]   ;;  %v1135_v30 = vld [vmem:[%s1481_s14 + $0xc0] sm:$0xff]  }
  0x5f   : > { %v1132_v27 = vld [vmem:[%s1481_s14 + $0x8] sm:$0xff]   ;;  %v1136_v31 = vld [vmem:[%s1481_s14] sm:$0xff]  }
  0x60   : > { %984 = vmatpush3.bf16.msra.mxu0 %v1116_v11  ;;  %v1133_v28 = vld [vmem:[%s1481_s14 + $0x88] sm:$0xff]   ;;  %v1137_v32 = vld [vmem:[%s1481_s14 + $0x80] sm:$0xff]  }
  0x61   : > { %1006 = vmatpush3.bf16.msra.mxu1 %v1117_v12  ;;  %985 = vmatprep.subr.bf16.mxu0 %v1118_v13  ;;  %v293_v33 = vld [vmem:[%s1474_s11] sm:$0xff]  ;;  %v294_v34 = vld [vmem:[%s1474_s11 + $0x8] sm:$0xff] }
  0x62   : > { %1007 = vmatprep.subr.bf16.mxu1 %v1119_v14  ;;  %v920_v35 = vcombine.low %v293_v33, %v293_v33  ;;  %v921_v36 = vcombine.high %v293_v33, %v293_v33  ;;  %v922_v37 = vcombine.low %v294_v34, %v294_v34  ;;  %v923_v38 = vcombine.high %v294_v34, %v294_v34 }
  0x64   : > { %986 = vmatpush3.bf16.msra.mxu0 %v1120_v15  ;;  %597 = vmatprep.mubr.bf16.mxu0 %v921_v36 }
  0x65   : > { %1008 = vmatpush3.bf16.msra.mxu1 %v1121_v16  ;;  %987 = vmatprep.subr.bf16.mxu0 %v1122_v17 }
  0x66   : > { %1009 = vmatprep.subr.bf16.mxu1 %v1123_v18  ;;  %637 = vmatprep.mubr.bf16.mxu1 %v923_v38 }
  0x68   : > { %988 = vmatpush3.bf16.msra.mxu0 %v1124_v19 }
  0x69   : > { %1010 = vmatpush3.bf16.msra.mxu1 %v1125_v20  ;;  %989 = vmatprep.subr.bf16.mxu0 %v1126_v21 }
  0x6a   : > { %1011 = vmatprep.subr.bf16.mxu1 %v1127_v22 }
  0x6c   : > { %990 = vmatpush3.bf16.msra.mxu0 %v1128_v23 }
  0x6d   : > { %1012 = vmatpush3.bf16.msra.mxu1 %v1129_v24  ;;  %991 = vmatprep.subr.bf16.mxu0 %v1130_v25 }
  0x6e   : > { %1013 = vmatprep.subr.bf16.mxu1 %v1131_v26 }
  0x70   : > { %992 = vmatpush3.bf16.msra.mxu0 %v1132_v27 }
  0x71   : > { %1014 = vmatpush3.bf16.msra.mxu1 %v1133_v28  ;;  %993 = vmatprep.subr.bf16.mxu0 %v1134_v29 }
  0x72   : > { %1015 = vmatprep.subr.bf16.mxu1 %v1135_v30 }
  0x74   : > { %994 = vmatpush3.bf16.msra.mxu0 %v1136_v31 }
  0x75   : > { %1016 = vmatpush3.bf16.msra.mxu1 %v1137_v32 }
  0x77   : > { %598 = vmatmul.mubr.bf16.vlgmr.msra.gmra.mxu0 %v920_v35 }
  0x78   : > { %638 = vmatmul.mubr.bf16.vlgmr.msra.gmra.mxu1 %v922_v37 }
 0x137   : > { %v995_v39 = vpop.f32.mrf.mxu0 }
 0x138   : > { %v1017_v40 = vpop.f32.mrf.mxu1 }
 0x139   : > { %v996_v41 = vpop.f32.mrf.mxu0 }
 0x13a   : > { %v1018_v42 = vpop.f32.mrf.mxu1  ;;  %v997_v43 = vadd.f32 %v996_v41, %v995_v39 }
 0x13b   : > { %v1019_v44 = vadd.f32 %v1018_v42, %v1017_v40  ;;  %v998_v46 = vpop.f32.mrf.mxu0 }
 0x13c   : > { %v1020_v47 = vpop.f32.mrf.mxu1 }
 0x13d   : > { %v640_v48 = vadd.f32 %v1019_v44, %v997_v43  ;;  %v999_v49 = vpop.f32.mrf.mxu0  ;;  %650 = sbr.rel (%p956_p1) target bundleno = 688 (0x2b0), region = 56 }
 0x13e   : > { %v1021_v50 = vpop.f32.mrf.mxu1 }
 0x13f   : > { %v645_v51 = vadd.f32 %v640_v48, %v292_v45 }
 0x141   : > { %646 = vst [vmem:[#allocation2] sm:$0xff] %v645_v51 }
 0x142   : > { %v1142_v54 = vld [vmem:[#allocation8 + $0x74] ss:$8 sps:$4 sm:$0xff]   ;;  %v1144_v55 = vld [vmem:[#allocation8 + $0x70] ss:$8 sps:$4 sm:$0xff]   ;;  %v1145_v56 = vld [vmem:[#allocation8 + $0x64] ss:$8 sps:$4 sm:$0xff]  }
 0x143   : > { %755 = vmatprep.subr.bf16.mxu0 %v1142_v54  ;;  %v1147_v57 = vld [vmem:[#allocation8 + $0x60] ss:$8 sps:$4 sm:$0xff]   ;;  %v1148_v58 = vld [vmem:[#allocation8 + $0x54] ss:$8 sps:$4 sm:$0xff]   ;;  %v1150_v59 = vld [vmem:[#allocation8 + $0x50] ss:$8 sps:$4 sm:$0xff]  }
 0x144   : > { %756 = vmatpush1.bf16.msra.mxu0 %v1144_v55  ;;  %v1151_v60 = vld [vmem:[#allocation8 + $0x44] ss:$8 sps:$4 sm:$0xff]   ;;  %v1153_v61 = vld [vmem:[#allocation8 + $0x40] ss:$8 sps:$4 sm:$0xff]   ;;  %v1154_v62 = vld [vmem:[#allocation8 + $0x34] ss:$8 sps:$4 sm:$0xff]  }
 0x145   : > { %757 = vmatprep.subr.bf16.mxu0 %v1145_v56  ;;  %v1156_v63 = vld [vmem:[#allocation8 + $0x30] ss:$8 sps:$4 sm:$0xff]   ;;  %v1157_v0 = vld [vmem:[#allocation8 + $0x24] ss:$8 sps:$4 sm:$0xff]   ;;  %v1345_v1 = vmov 0  }
 0x146   : > { %787 = vmatprep.mubr.bf16.mxu0 %v1345_v1  ;;  %v1159_v2 = vld [vmem:[#allocation8 + $0x20] ss:$8 sps:$4 sm:$0xff]   ;;  %v1160_v3 = vld [vmem:[#allocation8 + $0x14] ss:$8 sps:$4 sm:$0xff]   ;;  %v1162_v4 = vld [vmem:[#allocation8 + $0x10] ss:$8 sps:$4 sm:$0xff]  }
 0x147   : > { %v1163_v5 = vld [vmem:[#allocation8 + $0x4] ss:$8 sps:$4 sm:$0xff]   ;;  %v1165_v6 = vld [vmem:[#allocation8] ss:$8 sps:$4 sm:$0xff]  }
 0x148   : > { %v651_v52 = vld [vmem:[#allocation2] sm:$0xff]  ;;  %758 = vmatpush1.bf16.msra.mxu0 %v1147_v57 }
 0x149   : > { %v652_v53 = vmul.f32 %v651_v52, %v651_v52  ;;  %759 = vmatprep.subr.bf16.mxu0 %v1148_v58 }
 0x14b   : > { %653 = vadd.xlane.f32.xlu0 %v652_v53 }
 0x14c   : > { %760 = vmatpush1.bf16.msra.mxu0 %v1150_v59 }
 0x14d   : > { %761 = vmatprep.subr.bf16.mxu0 %v1151_v60 }
 0x150   : > { %762 = vmatpush1.bf16.msra.mxu0 %v1153_v61 }
 0x151   : > { %763 = vmatprep.subr.bf16.mxu0 %v1154_v62 }
 0x154   : > { %764 = vmatpush1.bf16.msra.mxu0 %v1156_v63 }
 0x155   : > { %765 = vmatprep.subr.bf16.mxu0 %v1157_v0 }
 0x158   : > { %766 = vmatpush1.bf16.msra.mxu0 %v1159_v2 }
 0x159   : > { %767 = vmatprep.subr.bf16.mxu0 %v1160_v3 }
 0x15c   : > { %768 = vmatpush1.bf16.msra.mxu0 %v1162_v4 }
 0x15d   : > { %769 = vmatprep.subr.bf16.mxu0 %v1163_v5 }
 0x160   : > { %770 = vmatpush1.bf16.msra.mxu0 %v1165_v6 }
 0x1d4   : > { %v654_v7 = vpop.xlane.xlu0 %653 }
 0x1d5   : > { %v655_v8 = vmax.f32 %v654_v7, 1e-12 }
 0x1d7   : > { %1166 = vrsqrt.f32 %v655_v8 }
 0x1e4   : > { %v1167_v9 = vpop.eup %1166 }
 0x1e5   : > { %v657_v10 = vmul.f32 %v1167_v9, %v651_v52 }
 0x1e7   : > { %v658_v11 = vpack.c.bf16 %v657_v10, %v657_v10 }
 0x1e9   : > { %788 = vmatmul.mubr.bf16.vlgmr.msra.gmra.mxu0 %v658_v11 }
 0x2a9   : > { %v789_v12 = vpop.f32.mrf.mxu0 }
 0x2aa   : > { %796 = vst [vmem:[#allocation9] sm:$0xff] %v789_v12 }
 0x2ab   : > { %v791_v13 = vpop.f32.mrf.mxu0 }
 0x2ac   : > { %797 = vst [vmem:[#allocation9 + $0x8] sm:$0xff] %v791_v13 }
 0x2ad   : > { %v793_v14 = vpop.f32.mrf.mxu0 }
 0x2af   : > { %v794_v15 = vpop.f32.mrf.mxu0 }
 0x2b0 PF: > { %p1049_p4 = scmp.eq.s32.totalorder %s1401_s21, 1  ;;  %s1346_s18 = smov [#allocation9]  }
 0x2b1   : > { %s808_s22 = sshll.u32 %s1346_s18, 4  ;;  %s809_s22 = int_to_ptr.vmem [resolvable:$true] %s808_s22 }
 0x2b2   : > { %s1250_s5 = scalar_lea.vmem %s809_s22, 256  ;;  %p1257_p9 = scmp.lt.s32.totalorder %s809_s22, %s809_s22 }
 0x2b3   : > { %p1251_p7 = scmp.ne.s32.totalorder %s809_s22, %s1250_s5  ;;  %p1258_p10 = scmp.lt.s32.totalorder %s1250_s5, %s1250_s5 }
 0x2b5   : > { %p1252_p12 = pnand %p1251_p7, %p1049_p4  ;;  %p1259_p11 = por %p1258_p10, %p1257_p9 }
 0x2b7   : > { %p1253_p8 = pneg %p1252_p12 }
 0x2b9   : > { %p1260_p13 = pnand %p1259_p11, %p1253_p8 }
 0x2bb   : > { %1263 = shalt.err (!%p1260_p13)
}
 0x2bc   : > { %1032 = dma.vmem_to_hbm [thread:$0]  (%p1049_p4), %s809_s22, 256, %s1564_s4, [#allocation5]  }
 0x2bd   : > { %1311 = dma.done.wait (%p1049_p4), [#allocation5], 256  }
 0x2be   : > { %1313 = vsyncadd (%p1049_p4), [#allocation5], 4294967040 }
 0x2bf PF: > { %s21_s20 = sadd.s32 1, %s1336_s20   ;;  %s1569_s15 = smov %s1320_s16 }
 0x2c0   : > { %p18_p0 = scmp.ge.s32.totalorder %s21_s20, 4   ;;  %s1570_s16 = smov %s1324_s17 }
 0x2c1   : > { %s1571_s17 = smov %s1445_s12  ;;  %s1572_s18 = smov %s1332_s19 }
 0x2c2   : > { %s1573_s19 = smov %s1575_s27  ;;  %20 = sbr.rel (!%p18_p0) target bundleno = 7 (0x7), region = 99 }
 0x2c7   :  { %821 = vsyncpa [#allocation4], 1 }
 0x2c8   :  { %823 = vsyncpa [#allocation4 + $0x1], 1 }
 0x2c9   :  { %824 = vsyncpa [#allocation7], 1 }
 0x2ca   :  { %826 = vsyncpa [#allocation7 + $0x1], 1 }
 0x2cb   :  { %827 = vsyncpa [#allocation5], 1 }
 0x2cc   :  { %829 = vsyncpa [#allocation5 + $0x1], 1 }

</bundles_post_ra>
